<compile_context>
chip_gen: v7x
topology: tpu7x:2x2x1
jax: 0.10.0
libtpu: 0.0.40
codegen_flags: <defaults>
</compile_context>

<pallas_src>
import functools

import jax
import jax.numpy as jnp
from jax.experimental import pallas as pl
from jax.experimental.pallas import tpu as pltpu


def _round_up(v, m):
    return (v + m - 1) // m * m


def _make_kernel(matmul_dtype):
    def kernel(x_ref, w_ref, b_ref, logits_ref, probas_ref):
        # logits = x @ W^T + b  (weight arrives pre-transposed as (K, N); f32 accumulation).
        x = x_ref[...].astype(matmul_dtype)
        logits = jnp.dot(x, w_ref[...], preferred_element_type=jnp.float32)
        logits = logits + b_ref[...]
        logits_ref[...] = logits.astype(logits_ref.dtype)

        # Softmax over the class (last) axis == torch dim=1 for a 2D input.
        m = jnp.max(logits, axis=-1, keepdims=True)
        e = jnp.exp(logits - m)
        denom = jnp.sum(e, axis=-1, keepdims=True)
        probas_ref[...] = (e / denom).astype(probas_ref.dtype)

    return kernel


@functools.partial(jax.jit, static_argnames=("tile_b", "matmul_dtype"))
def softmax_regression2(x, weight, bias, *, tile_b=2048, matmul_dtype=jnp.bfloat16):
    """Forward of SoftmaxRegression2. Returns (logits, probas), both f32 (batch, num_classes)."""
    batch, num_features = x.shape
    num_classes = weight.shape[0]
    md = jnp.dtype(matmul_dtype)

    # Resident operands (tiny): pre-transpose the weight once to (K, N); bias as a (1, N) f32
    # row.  Both are loaded once and stay in VMEM across all grid steps.
    w_t = jnp.transpose(weight).astype(md)
    b_row = bias.reshape(1, num_classes).astype(jnp.float32)

    # ----- batch-tile selection: multiple of 8, as large as useful, >= 2 grid steps if possible.
    tile_b = max(8, _round_up(min(int(tile_b), batch), 8))
    if batch >= 16:
        # Keep at least two grid steps so the "parallel" axis shards across v7x's 2 TensorCores.
        tile_b = min(tile_b, _round_up(pl.cdiv(batch, 2), 8))

    # VMEM footprint using Mosaic's internal (8, 128) layout padding; the resident weight is
    # accounted as double-buffered by the pipeline.  Shrink tile_b to stay inside a budget that
    # is safe on v7x's 64 MiB per-TC VMEM.
    lane = 128
    k_v = _round_up(num_features, lane)
    n_v = _round_up(num_classes, lane)
    x_itemsize = jnp.dtype(x.dtype).itemsize

    def footprint(tb):
        return (
            2 * tb * k_v * x_itemsize        # x tile, double-buffered
            + 2 * k_v * n_v * md.itemsize    # resident W (double-buffer accounted)
            + 2 * 8 * n_v * 4                # bias row
            + 2 * 2 * tb * n_v * 4           # two f32 output tiles, double-buffered
        )

    vmem_budget = 48 * 1024 * 1024
    while tile_b > 8 and footprint(tile_b) > vmem_budget:
        tile_b = max(8, _round_up(tile_b // 2, 8))
    # TODO(synk): if num_features is so large that even tile_b=8 exceeds the budget, add a K
    # grid axis ("arbitrary", last) with an f32 VMEM accumulator and run the softmax on the
    # final K step instead of relying on the limit clamp below.
    vmem_limit = int(min(max(2 * footprint(tile_b), 16 * 1024 * 1024), 64 * 1024 * 1024))

    grid = (pl.cdiv(batch, tile_b),)

    logits, probas = pl.pallas_call(
        _make_kernel(md),
        out_shape=(
            jax.ShapeDtypeStruct((batch, num_classes), jnp.float32),
            jax.ShapeDtypeStruct((batch, num_classes), jnp.float32),
        ),
        grid_spec=pltpu.PrefetchScalarGridSpec(
            num_scalar_prefetch=0,
            grid=grid,
            in_specs=[
                pl.BlockSpec((tile_b, num_features), lambda i: (i, 0)),       # x: batch-tiled
                pl.BlockSpec((num_features, num_classes), lambda i: (0, 0)),  # W^T: resident
                pl.BlockSpec((1, num_classes), lambda i: (0, 0)),             # bias: resident
            ],
            out_specs=[
                pl.BlockSpec((tile_b, num_classes), lambda i: (i, 0)),
                pl.BlockSpec((tile_b, num_classes), lambda i: (i, 0)),
            ],
        ),
        compiler_params=pltpu.CompilerParams(
            dimension_semantics=("parallel",),
            vmem_limit_bytes=vmem_limit,
        ),
    )(x, w_t, b_row)

    return logits, probas


if __name__ == "__main__":
    key = jax.random.PRNGKey(0)
    num_features, num_classes = 32, 16
    kx, kw, kb, kx2 = jax.random.split(key, 4)

    def torch_like_ref(x, weight, bias, md=jnp.bfloat16):
        # Reference with the same bf16 rounding of the matmul inputs the kernel performs.
        xb = x.astype(md).astype(jnp.float32)
        wb = weight.astype(md).astype(jnp.float32)
        logits = xb @ wb.T + bias
        return logits, jax.nn.softmax(logits, axis=1)

    # --- Module semantics: __init__ zeroes both weight and bias deterministically. ---
    batch = 8
    x = jax.random.normal(kx, (batch, num_features), dtype=jnp.float32)
    weight0 = jnp.zeros((num_classes, num_features), dtype=jnp.float32)
    bias0 = jnp.zeros((num_classes,), dtype=jnp.float32)

    logits, probas = softmax_regression2(x, weight0, bias0)
    jax.block_until_ready((logits, probas))
    assert logits.shape == (batch, num_classes)
    assert probas.shape == (batch, num_classes)
    # Zero weights/bias -> logits exactly 0, probas exactly uniform 1/num_classes.
    assert jnp.allclose(logits, 0.0, atol=1e-6)
    assert jnp.allclose(probas, 1.0 / num_classes, atol=1e-6)

    # --- Structural check with nonzero weights (bf16 matmul inputs, f32 accumulation). ---
    weight1 = 0.1 * jax.random.normal(kw, (num_classes, num_features), dtype=jnp.float32)
    bias1 = 0.1 * jax.random.normal(kb, (num_classes,), dtype=jnp.float32)

    logits1, probas1 = softmax_regression2(x, weight1, bias1)
    jax.block_until_ready((logits1, probas1))
    ref_logits1, ref_probas1 = torch_like_ref(x, weight1, bias1)
    assert jnp.allclose(logits1, ref_logits1, atol=1e-3)
    assert jnp.allclose(probas1, ref_probas1, atol=1e-3)
    assert jnp.allclose(probas1.sum(axis=1), 1.0, atol=1e-5)

    # --- Ragged batch (not a multiple of 8) + 2-step grid exercises the unpadded path. ---
    batch2 = 29
    x2 = jax.random.normal(kx2, (batch2, num_features), dtype=jnp.float32)
    logits2, probas2 = softmax_regression2(x2, weight1, bias1)
    jax.block_until_ready((logits2, probas2))
    ref_logits2, ref_probas2 = torch_like_ref(x2, weight1, bias1)
    assert logits2.shape == (batch2, num_classes)
    assert jnp.allclose(logits2, ref_logits2, atol=1e-3)
    assert jnp.allclose(probas2, ref_probas2, atol=1e-3)

    print("KERNEL_OK")
</pallas_src>

<mosaic_0001>
module attributes {stable_mosaic.version = 11 : i64} {
  func.func @kernel(%arg0: i32, %arg1: memref<8x32xf32, #tpu.memory_space<vmem>>, %arg2: memref<32x16xbf16, #tpu.memory_space<vmem>>, %arg3: memref<1x16xf32, #tpu.memory_space<vmem>>, %arg4: memref<8x16xf32, #tpu.memory_space<vmem>>, %arg5: memref<8x16xf32, #tpu.memory_space<vmem>>) attributes {dimension_semantics = [#tpu.dimension_semantics<parallel>], iteration_bounds = array<i64: 1>, scalar_prefetch = 0 : i64, scratch_operands = 0 : i64, tpu.core_type = #tpu.core_type<tc>, window_params = [{transform_indices = @transform_0, window_bounds = array<i64: 8, 32>}, {pipeline_mode = #tpu.pipeline_mode<synchronous>, transform_indices = @transform_1, window_bounds = array<i64: 32, 16>}, {pipeline_mode = #tpu.pipeline_mode<synchronous>, transform_indices = @transform_2, window_bounds = array<i64: 1, 16>}, {transform_indices = @transform_3, window_bounds = array<i64: 8, 16>}, {transform_indices = @transform_4, window_bounds = array<i64: 8, 16>}]} {
    %c0 = arith.constant 0 : index
    %c0_0 = arith.constant 0 : index
    %0 = vector.load %arg1[%c0, %c0_0] : memref<8x32xf32, #tpu.memory_space<vmem>>, vector<8x32xf32>
    %1 = arith.truncf %0 : vector<8x32xf32> to vector<8x32xbf16>
    %c0_1 = arith.constant 0 : index
    %c0_2 = arith.constant 0 : index
    %2 = vector.load %arg2[%c0_1, %c0_2] : memref<32x16xbf16, #tpu.memory_space<vmem>>, vector<32x16xbf16>
    %cst = arith.constant dense<0.000000e+00> : vector<8x16xf32>
    %3 = tpu.matmul %1, %2, %cst {dimension_numbers = #tpu.dot_dimension_numbers<[1], [0], [0], [1], [0, 0, 1, 1], [], []>} : vector<8x32xbf16>, vector<32x16xbf16>, vector<8x16xf32> -> vector<8x16xf32>
    %c0_3 = arith.constant 0 : index
    %c0_4 = arith.constant 0 : index
    %4 = vector.load %arg3[%c0_3, %c0_4] : memref<1x16xf32, #tpu.memory_space<vmem>>, vector<1x16xf32>
    %5 = vector.broadcast %4 : vector<1x16xf32> to vector<8x16xf32>
    %6 = arith.addf %3, %5 : vector<8x16xf32>
    %c0_5 = arith.constant 0 : index
    %c0_6 = arith.constant 0 : index
    %7 = vector.load %arg4[%c0_5, %c0_6] : memref<8x16xf32, #tpu.memory_space<vmem>>, vector<8x16xf32>
    tpu.vector_store %arg4[%c0_5, %c0_6], %6 {strides = array<i32>} : memref<8x16xf32, #tpu.memory_space<vmem>>, vector<8x16xf32>,
    %cst_7 = arith.constant dense<0xFF800000> : vector<8xf32>
    %8 = vector.multi_reduction <maximumf>, %6, %cst_7 [1] : vector<8x16xf32> to vector<8xf32>
    %9 = vector.shape_cast %8 : vector<8xf32> to vector<8x1xf32>
    %10 = vector.broadcast %9 : vector<8x1xf32> to vector<8x16xf32>
    %11 = arith.subf %6, %10 : vector<8x16xf32>
    %12 = math.exp %11 : vector<8x16xf32>
    %cst_8 = arith.constant dense<0.000000e+00> : vector<8xf32>
    %13 = vector.multi_reduction <add>, %12, %cst_8 [1] : vector<8x16xf32> to vector<8xf32>
    %14 = vector.shape_cast %13 : vector<8xf32> to vector<8x1xf32>
    %15 = vector.broadcast %14 : vector<8x1xf32> to vector<8x16xf32>
    %16 = arith.divf %12, %15 : vector<8x16xf32>
    %c0_9 = arith.constant 0 : index
    %c0_10 = arith.constant 0 : index
    %17 = vector.load %arg5[%c0_9, %c0_10] : memref<8x16xf32, #tpu.memory_space<vmem>>, vector<8x16xf32>
    tpu.vector_store %arg5[%c0_9, %c0_10], %16 {strides = array<i32>} : memref<8x16xf32, #tpu.memory_space<vmem>>, vector<8x16xf32>,
    return
  }
  func.func @transform_0(%arg0: i32) -> (i32, i32) {
    %c0_i32 = arith.constant 0 : i32
    %c0_i32_0 = arith.constant 0 : i32
    return %arg0, %c0_i32 : i32, i32
  }
  func.func @transform_1(%arg0: i32) -> (i32, i32) {
    %c0_i32 = arith.constant 0 : i32
    %c0_i32_0 = arith.constant 0 : i32
    %c0_i32_1 = arith.constant 0 : i32
    return %c0_i32, %c0_i32_0 : i32, i32
  }
  func.func @transform_2(%arg0: i32) -> (i32, i32) {
    %c0_i32 = arith.constant 0 : i32
    %c0_i32_0 = arith.constant 0 : i32
    %c0_i32_1 = arith.constant 0 : i32
    return %c0_i32, %c0_i32_0 : i32, i32
  }
  func.func @transform_3(%arg0: i32) -> (i32, i32) {
    %c0_i32 = arith.constant 0 : i32
    %c0_i32_0 = arith.constant 0 : i32
    return %arg0, %c0_i32 : i32, i32
  }
  func.func @transform_4(%arg0: i32) -> (i32, i32) {
    %c0_i32 = arith.constant 0 : i32
    %c0_i32_0 = arith.constant 0 : i32
    return %arg0, %c0_i32 : i32, i32
  }
}

</mosaic_0001>

<bundles_post_ra>
// kernel: softmax_regression2.1
= control target key start
LH: loop header
LB: loop body
LE: loop exit
PB: predicated region body
PF: predicated region fallthrough
CT: control target
= control target key end

     0   :  { %10 = vsyncpa [#allocation3], 0  ;;  %v203_v1 = vmov 0.0   ;;  %vm204_vm0 = vmmov 0   ;;  %s272_s0 = inlined_call_operand.vmem [shape: f32[8,32], index: 0, kind: input, shape index: {}]   ;;  %s273_s1 = inlined_call_operand.vmem [shape: bf16[32,16], index: 1, kind: input, shape index: {}]   ;;  %s274_s2 = inlined_call_operand.vmem [shape: f32[1,16], index: 2, kind: input, shape index: {}]   ;;  %s275_s3 = inlined_call_operand.hbm [shape: f32[8,16], index: 3, kind: output, shape index: {0}]   ;;  %s276_s4 = inlined_call_operand.hbm [shape: f32[8,16], index: 4, kind: output, shape index: {1}]  }
   0x1   :  { %v149_v0 = vld [vmem:[%s273_s1] sm:$0xff]   ;;  %137 = vmatprep.subr.bf16.mxu0 %v203_v1  ;;  %v150_v2 = vld [vmem:[%s273_s1 + $0x8] sm:$0xff]   ;;  %141 = vmatprep.mubr.msk.bf16.mxu0 %vm204_vm0, %v203_v1 }
   0x2   :  { %138 = vmatpush3.bf16.msra.mxu0 %v149_v0  ;;  %v19_v3 = vld [vmem:[%s272_s0] sm:$0xff] }
   0x3   :  { %11 = vsyncpa [#allocation5], 0  ;;  %139 = vmatprep.subr.bf16.mxu0 %v203_v1  ;;  %v20_v4 = vpack.c.bf16 %v19_v3, %v19_v3  ;;  %vm44_vm1 = vcmask 261120   ;;  %v130_v5 = vld [vmem:[%s274_s2] ss:$0 sm:$0xff]  ;;  %vm88_vm2 = vcmask 130048  }
   0x4   :  { %s205_s0 = smov [#allocation2]  }
   0x5   :  { %s108_s1 = sshll.u32 %s205_s0, 4  ;;  %s109_s1 = int_to_ptr.vmem [resolvable:$true] %s108_s1 }
   0x6   :  { %140 = vmatpush3.bf16.msra.mxu0 %v150_v2  ;;  %s155_s2 = scalar_lea.vmem %s109_s1, 128  ;;  %p160_p1 = scmp.lt.s32.totalorder %s109_s1, %s109_s1 }
   0x7   :  { %p156_p0 = scmp.ne.s32.totalorder %s109_s1, %s155_s2  ;;  %p161_p2 = scmp.lt.s32.totalorder %s155_s2, %s155_s2 }
   0x9   :  { %142 = vmatmul.mubr.msk.bf16.vlgmr.msra.gmra.mrb[0].mxu0 %vm44_vm1, %v20_v4  ;;  %p162_p3 = por %p161_p2, %p160_p1 }
   0xb   :  { %p163_p4 = pnand %p162_p3, %p156_p0 }
  0xdc   :  { %v82_v6 = vpop.f32.mrb[0].mxu0 }
  0xdd   :  { %v83_v7 = vadd.f32 %v130_v5, %v82_v6  ;;  %v143_v8 = vpop.f32.mrb[1].mxu0 }
  0xde   :  { %v85_v9 = vpop.f32.mrb[2].mxu0 }
  0xdf   :  { %v144_v10 = vpop.f32.mrb[3].mxu0  ;;  %v90_v11 = vsel %vm88_vm2, %v83_v7, -inf  ;;  %89 = vst.msk [vmem:[#allocation2] sm:$0xff] %vm88_vm2, %v83_v7 }
  0xe0   :  { %91 = vmax.xlane.f32.xlu0 %v90_v11 }
 0x16d   :  { %v92_v12 = vpop.xlane.xlu0 %91 }
 0x16e   :  { %v93_v13 = vsub.f32 %v83_v7, %v92_v12 }
 0x170   :  { %v94_v14 = vmul.f32 1.442695, %v93_v13 }
 0x172   :  { %151 = vpow2.f32 %v94_v14 }
 0x17c   :  { %v152_v15 = vpop.eup %151 }
 0x17d   :  { %v96_v16 = vsel %vm88_vm2, %v152_v15, 0.0 }
 0x17e   :  { %97 = vadd.xlane.f32.xlu0 %v96_v16 }
 0x17f   :  { %166 = shalt.err (!%p163_p4)
}
 0x180   :  { %s167_s25 = scalar_lea.hbm %s275_s3, 128 }
 0x181   :  { %p168_p5 = scmp.ne.s32.totalorder %s275_s3, %s167_s25  ;;  %p171_p6 = scmp.lt.u32.totalorder %s167_s25, %s275_s3 }
 0x183   :  { %p173_p7 = pnand %p171_p6, %p168_p5 }
 0x185   :  { %176 = shalt.err (!%p173_p7)
}
 0x186   :  { %111 = dma.vmem_to_hbm [thread:$0]  %s109_s1, 128, %s275_s3, [#allocation3]  }
 0x187   :  { %s206_s6 = smov [#allocation4]  }
 0x188   :  { %s118_s7 = sshll.u32 %s206_s6, 4  ;;  %s119_s7 = int_to_ptr.vmem [resolvable:$true] %s118_s7 }
 0x189   :  { %s177_s8 = scalar_lea.vmem %s119_s7, 128  ;;  %p182_p9 = scmp.lt.s32.totalorder %s119_s7, %s119_s7 }
 0x18a   :  { %p178_p8 = scmp.ne.s32.totalorder %s119_s7, %s177_s8  ;;  %p183_p10 = scmp.lt.s32.totalorder %s177_s8, %s177_s8 }
 0x18c   :  { %p184_p11 = por %p183_p10, %p182_p9 }
 0x18e   :  { %p185_p12 = pnand %p184_p11, %p178_p8 }
 0x20b   :  { %v98_v17 = vpop.xlane.xlu0 %97 }
 0x20c   :  { %153 = vrcp.f32 %v98_v17 }
 0x216   :  { %v154_v18 = vpop.eup %153 }
 0x217   :  { %v100_v19 = vmul.f32 %v154_v18, %v152_v15 }
 0x219   :  { %101 = vst.msk [vmem:[#allocation4] sm:$0xff] %vm88_vm2, %v100_v19 }
 0x21a   :  { %188 = shalt.err (!%p185_p12)
}
 0x21b   :  { %s189_s3 = scalar_lea.hbm %s276_s4, 128 }
 0x21c   :  { %p190_p13 = scmp.ne.s32.totalorder %s276_s4, %s189_s3  ;;  %p193_p0 = scmp.lt.u32.totalorder %s189_s3, %s276_s4 }
 0x21e   :  { %p195_p1 = pnand %p193_p0, %p190_p13 }
 0x220   :  { %198 = shalt.err (!%p195_p1)
}
 0x221   :  { %121 = dma.vmem_to_hbm [thread:$0]  %s119_s7, 128, %s276_s4, [#allocation5]  }
 0x222   :  { %199 = dma.done.wait [#allocation3], 128  }
 0x223   :  { %200 = vsyncadd [#allocation3], 4294967168 }
 0x224   :  { %201 = dma.done.wait [#allocation5], 128  }
 0x225   :  { %202 = vsyncadd [#allocation5], 4294967168 }
 0x226   :  { %128 = vsyncpa [#allocation3], 1 }
 0x227   :  { %129 = vsyncpa [#allocation5], 1 }

</bundles_post_ra>
